<compile_context>
chip_gen: v5e
topology: v5e:2x2
jax: 0.10.0
libtpu: 0.0.40
codegen_flags: <defaults>
</compile_context>

<pallas_src>
import jax
import jax.numpy as jnp
from jax.experimental import pallas as pl
from jax.experimental.pallas import tpu as pltpu


def _round_up(x, m):
    return (x + m - 1) // m * m


def _ffpolicy_kernel(x_ref, w1_ref, b1_ref, wv_ref, bv_ref,
                     value_ref, feat_ref, acc_ref):
    # x_ref:  [TB, TK]      input tile (native dtype, cast in-kernel)
    # w1_ref: [TK, HIDp]    hidden projection tile (bf16)
    # b1_ref: [1, HIDp]     hidden bias (f32)
    # wv_ref: [1, HIDp]     critic weights (f32)
    # bv_ref: [1, 1]        critic bias (SMEM scalar)
    # value_ref: [TB, 128]  lane-padded value output
    # feat_ref:  [TB, HIDp] actor features output
    # acc_ref:   [TB, HIDp] f32 accumulator (persists across K steps)
    k = pl.program_id(1)

    @pl.when(k == 0)
    def _init():
        acc_ref[...] = jnp.zeros_like(acc_ref)

    # Main GEMM: bf16 operands on the MXU, f32 accumulation.
    x = x_ref[...].astype(jnp.bfloat16)
    acc_ref[...] += jnp.dot(x, w1_ref[...],
                            preferred_element_type=jnp.float32)

    @pl.when(k == pl.num_programs(1) - 1)
    def _finalize():
        # Bias + ReLU only in the epilogue (no re-broadcast per K step).
        h = jnp.maximum(acc_ref[...] + b1_ref[...], 0.0)
        feat_ref[...] = h.astype(feat_ref.dtype)
        # Critic head: N=1 matmul replaced by VPU multiply + XLU lane reduce.
        v = jnp.sum(h * wv_ref[...], axis=-1, keepdims=True) + bv_ref[0, 0]
        value_ref[...] = jnp.broadcast_to(v, value_ref.shape).astype(
            value_ref.dtype)


def init_params(key, D, HID):
    """Logical (unpadded, f32) FFPolicy parameters."""
    k1, k2 = jax.random.split(key)
    w1 = jax.random.normal(k1, (D, HID), jnp.float32) * 0.02
    b1 = jnp.zeros((1, HID), jnp.float32)
    wv = jax.random.normal(k2, (HID, 1), jnp.float32) * 0.02
    bv = jnp.zeros((1, 1), jnp.float32)
    return (w1, b1, wv, bv)


def pack_ffpolicy(params, *, max_tk=512, batch_tile=128,
                  vmem_budget=16 << 20):
    """One-time packing of params into kernel layout (padded, bf16 weights)."""
    w1, b1, wv, bv = params
    D, HID = w1.shape
    HIDp = _round_up(HID, 128)

    # Pick the K tile: large enough to amortize per-step overhead, small
    # enough that double-buffered x/w1 tiles fit the (v7x-safe) VMEM budget.
    tk = max_tk
    while tk > 256 and 2 * (batch_tile * tk * 4 + tk * HIDp * 2) > vmem_budget:
        tk //= 2
    tk = min(tk, _round_up(D, 128))
    Dp = _round_up(D, tk)

    w1p = jnp.pad(w1.astype(jnp.float32),
                  ((0, Dp - D), (0, HIDp - HID))).astype(jnp.bfloat16)
    b1p = jnp.pad(jnp.asarray(b1, jnp.float32).reshape(1, -1),
                  ((0, 0), (0, HIDp - HID)))
    wvp = jnp.pad(jnp.asarray(wv, jnp.float32).reshape(1, -1),
                  ((0, 0), (0, HIDp - HID)))
    bvp = jnp.asarray(bv, jnp.float32).reshape(1, 1)
    return dict(w1=w1p, b1=b1p, wv=wvp, bv=bvp,
                D=D, HID=HID, Dp=Dp, HIDp=HIDp, tk=tk)


def ffpolicy_forward(x_nchw, packed):
    """Concrete FFPolicy.forward: returns (value, actor_features, conv_list)."""
    B = x_nchw.shape[0]
    D, HID = packed["D"], packed["HID"]
    Dp, HIDp, tk = packed["Dp"], packed["HIDp"], packed["tk"]

    # torch .view(B, -1); keep native dtype, cast to bf16 inside the kernel.
    x_flat = x_nchw.reshape(B, -1)
    assert x_flat.shape[1] == D

    # Pad / tile the batch (sublane multiple; tile at 128 for large batches).
    bp = _round_up(B, 8)
    tb = bp if bp <= 128 else 128
    bp = _round_up(B, tb)
    x_flat = jnp.pad(x_flat, ((0, bp - B), (0, Dp - D)))

    n_b = bp // tb
    n_k = Dp // tk

    x_bytes = x_flat.dtype.itemsize
    # double-buffered input tiles + resident outputs + accumulator
    vmem_est = (2 * (tb * tk * x_bytes + tk * HIDp * 2 + 2 * HIDp * 4)
                + 2 * (tb * 128 * 4 + tb * HIDp * 4)
                + tb * HIDp * 4)
    vmem_limit = int(min(48 << 20, max(16 << 20, 2 * vmem_est)))

    cost = pl.CostEstimate(
        flops=2 * bp * Dp * HIDp + 3 * bp * HIDp,
        transcendentals=0,
        bytes_accessed=(bp * Dp * x_bytes + Dp * HIDp * 2
                        + bp * HIDp * 4 + bp * 128 * 4),
    )

    kernel = pl.pallas_call(
        _ffpolicy_kernel,
        out_shape=(
            jax.ShapeDtypeStruct((bp, 128), jnp.float32),    # value (lane-padded)
            jax.ShapeDtypeStruct((bp, HIDp), jnp.float32),   # actor features
        ),
        grid_spec=pltpu.PrefetchScalarGridSpec(
            num_scalar_prefetch=0,
            grid=(n_b, n_k),
            in_specs=[
                pl.BlockSpec((tb, tk), lambda b, k: (b, k)),        # x
                pl.BlockSpec((tk, HIDp), lambda b, k: (k, 0)),      # w1 (bf16)
                pl.BlockSpec((1, HIDp), lambda b, k: (0, 0)),       # b1
                pl.BlockSpec((1, HIDp), lambda b, k: (0, 0)),       # wv
                pl.BlockSpec(memory_space=pltpu.MemorySpace.SMEM),  # bv scalar
            ],
            out_specs=[
                pl.BlockSpec((tb, 128), lambda b, k: (b, 0)),
                pl.BlockSpec((tb, HIDp), lambda b, k: (b, 0)),
            ],
            scratch_shapes=[pltpu.VMEM((tb, HIDp), jnp.float32)],
        ),
        compiler_params=pltpu.CompilerParams(
            dimension_semantics=("parallel", "arbitrary"),
            vmem_limit_bytes=vmem_limit,
        ),
        cost_estimate=cost,
    )
    value_p, feat_p = kernel(x_flat, packed["w1"], packed["b1"],
                             packed["wv"], packed["bv"])
    value = value_p[:B, :1]
    feat = feat_p[:B, :HID]
    conv_list = []   # base FFPolicy has no conv stack
    return value, feat, conv_list


if __name__ == "__main__":
    key = jax.random.PRNGKey(0)
    kx, kp = jax.random.split(key)

    B, C, H, W = 2, 4, 16, 16           # small NCHW observation batch
    HID = 32
    D = C * H * W

    x = jax.random.normal(kx, (B, C, H, W), jnp.float32)
    params = init_params(kp, D, HID)
    packed = pack_ffpolicy(params)

    value, feat, conv_list = ffpolicy_forward(x, packed)
    jax.block_until_ready((value, feat))

    # Reference in plain JAX with the same bf16 operand rounding as the kernel
    # (f32 accumulation), so the comparison isolates kernel correctness.
    w1, b1, wv, bv = params
    x_flat = x.reshape(B, -1)
    xb = x_flat.astype(jnp.bfloat16).astype(jnp.float32)
    w1b = w1.astype(jnp.bfloat16).astype(jnp.float32)
    h_ref = jnp.maximum(xb @ w1b + b1, 0.0)
    v_ref = h_ref @ wv + bv

    assert value.shape == (B, 1) and feat.shape == (B, HID)
    assert conv_list == []
    assert jnp.allclose(feat, h_ref, atol=1e-3, rtol=1e-3)
    assert jnp.allclose(value, v_ref, atol=1e-3, rtol=1e-3)

    print("KERNEL_OK")
</pallas_src>

<mosaic_0001>
module attributes {stable_mosaic.version = 11 : i64} {
  func.func @_ffpolicy_kernel(%arg0: i32, %arg1: i32, %arg2: memref<8x512xf32, #tpu.memory_space<vmem>>, %arg3: memref<512x128xbf16, #tpu.memory_space<vmem>>, %arg4: memref<1x128xf32, #tpu.memory_space<vmem>>, %arg5: memref<1x128xf32, #tpu.memory_space<vmem>>, %arg6: memref<1x1xf32, #tpu.memory_space<smem>>, %arg7: memref<8x128xf32, #tpu.memory_space<vmem>>, %arg8: memref<8x128xf32, #tpu.memory_space<vmem>>, %arg9: memref<8x128xf32, #tpu.memory_space<vmem>>) attributes {dimension_semantics = [#tpu.dimension_semantics<parallel>, #tpu.dimension_semantics<arbitrary>], iteration_bounds = array<i64: 1, 2>, scalar_prefetch = 0 : i64, scratch_operands = 1 : i64, tpu.core_type = #tpu.core_type<tc>, window_params = [{transform_indices = @transform_0, window_bounds = array<i64: 8, 512>}, {transform_indices = @transform_1, window_bounds = array<i64: 512, 128>}, {pipeline_mode = #tpu.pipeline_mode<synchronous>, transform_indices = @transform_2, window_bounds = array<i64: 1, 128>}, {pipeline_mode = #tpu.pipeline_mode<synchronous>, transform_indices = @transform_3, window_bounds = array<i64: 1, 128>}, {transform_indices = @transform_4, window_bounds = array<i64: 1, 1>}, {transform_indices = @transform_5, window_bounds = array<i64: 8, 128>}, {transform_indices = @transform_6, window_bounds = array<i64: 8, 128>}]} {
    %c0_i32 = arith.constant 0 : i32
    %0 = arith.cmpi eq, %arg1, %c0_i32 : i32
    %1 = arith.extui %0 : i1 to i32
    %c0_i32_0 = arith.constant 0 : i32
    %2 = arith.cmpi ne, %1, %c0_i32_0 : i32
    scf.if %2 {
      %cst_9 = arith.constant 0.000000e+00 : f32
      %13 = vector.broadcast %cst_9 : f32 to vector<8x128xf32>
      %c0_10 = arith.constant 0 : index
      %c0_11 = arith.constant 0 : index
      %14 = vector.load %arg9[%c0_10, %c0_11] : memref<8x128xf32, #tpu.memory_space<vmem>>, vector<8x128xf32>
      tpu.vector_store %arg9[%c0_10, %c0_11], %13 {strides = array<i32>} : memref<8x128xf32, #tpu.memory_space<vmem>>, vector<8x128xf32>,
    } else {
    }
    %c0 = arith.constant 0 : index
    %c0_1 = arith.constant 0 : index
    %3 = vector.load %arg2[%c0, %c0_1] : memref<8x512xf32, #tpu.memory_space<vmem>>, vector<8x512xf32>
    %4 = arith.truncf %3 : vector<8x512xf32> to vector<8x512xbf16>
    %c0_2 = arith.constant 0 : index
    %c0_3 = arith.constant 0 : index
    %5 = vector.load %arg9[%c0_2, %c0_3] : memref<8x128xf32, #tpu.memory_space<vmem>>, vector<8x128xf32>
    %c0_4 = arith.constant 0 : index
    %c0_5 = arith.constant 0 : index
    %6 = vector.load %arg3[%c0_4, %c0_5] : memref<512x128xbf16, #tpu.memory_space<vmem>>, vector<512x128xbf16>
    %cst = arith.constant dense<0.000000e+00> : vector<8x128xf32>
    %7 = tpu.matmul %4, %6, %cst {dimension_numbers = #tpu.dot_dimension_numbers<[1], [0], [0], [1], [0, 0, 1, 1], [], []>} : vector<8x512xbf16>, vector<512x128xbf16>, vector<8x128xf32> -> vector<8x128xf32>
    %8 = arith.addf %5, %7 : vector<8x128xf32>
    %c0_6 = arith.constant 0 : index
    %c0_7 = arith.constant 0 : index
    %9 = vector.load %arg9[%c0_6, %c0_7] : memref<8x128xf32, #tpu.memory_space<vmem>>, vector<8x128xf32>
    tpu.vector_store %arg9[%c0_6, %c0_7], %8 {strides = array<i32>} : memref<8x128xf32, #tpu.memory_space<vmem>>, vector<8x128xf32>,
    %c1_i32 = arith.constant 1 : i32
    %10 = arith.cmpi eq, %arg1, %c1_i32 : i32
    %11 = arith.extui %10 : i1 to i32
    %c0_i32_8 = arith.constant 0 : i32
    %12 = arith.cmpi ne, %11, %c0_i32_8 : i32
    scf.if %12 {
      %c0_9 = arith.constant 0 : index
      %c0_10 = arith.constant 0 : index
      %13 = vector.load %arg9[%c0_9, %c0_10] : memref<8x128xf32, #tpu.memory_space<vmem>>, vector<8x128xf32>
      %c0_11 = arith.constant 0 : index
      %c0_12 = arith.constant 0 : index
      %14 = vector.load %arg4[%c0_11, %c0_12] : memref<1x128xf32, #tpu.memory_space<vmem>>, vector<1x128xf32>
      %15 = vector.broadcast %14 : vector<1x128xf32> to vector<8x128xf32>
      %16 = arith.addf %13, %15 : vector<8x128xf32>
      %cst_13 = arith.constant 0.000000e+00 : f32
      %17 = vector.broadcast %cst_13 : f32 to vector<8x128xf32>
      %18 = arith.maximumf %16, %17 : vector<8x128xf32>
      %c0_14 = arith.constant 0 : index
      %c0_15 = arith.constant 0 : index
      %19 = vector.load %arg8[%c0_14, %c0_15] : memref<8x128xf32, #tpu.memory_space<vmem>>, vector<8x128xf32>
      tpu.vector_store %arg8[%c0_14, %c0_15], %18 {strides = array<i32>} : memref<8x128xf32, #tpu.memory_space<vmem>>, vector<8x128xf32>,
      %c0_16 = arith.constant 0 : index
      %c0_17 = arith.constant 0 : index
      %20 = vector.load %arg5[%c0_16, %c0_17] : memref<1x128xf32, #tpu.memory_space<vmem>>, vector<1x128xf32>
      %21 = vector.broadcast %20 : vector<1x128xf32> to vector<8x128xf32>
      %22 = arith.mulf %18, %21 : vector<8x128xf32>
      %cst_18 = arith.constant dense<0.000000e+00> : vector<8xf32>
      %23 = vector.multi_reduction <add>, %22, %cst_18 [1] : vector<8x128xf32> to vector<8xf32>
      %24 = vector.shape_cast %23 : vector<8xf32> to vector<8x1xf32>
      %c0_19 = arith.constant 0 : index
      %c0_20 = arith.constant 0 : index
      %25 = memref.load %arg6[%c0_19, %c0_20] : memref<1x1xf32, #tpu.memory_space<smem>>
      %26 = vector.broadcast %25 : f32 to vector<8x1xf32>
      %27 = arith.addf %24, %26 : vector<8x1xf32>
      %28 = vector.shape_cast %27 : vector<8x1xf32> to vector<8x1xf32>
      %29 = vector.broadcast %28 : vector<8x1xf32> to vector<8x128xf32>
      %c0_21 = arith.constant 0 : index
      %c0_22 = arith.constant 0 : index
      %30 = vector.load %arg7[%c0_21, %c0_22] : memref<8x128xf32, #tpu.memory_space<vmem>>, vector<8x128xf32>
      tpu.vector_store %arg7[%c0_21, %c0_22], %29 {strides = array<i32>} : memref<8x128xf32, #tpu.memory_space<vmem>>, vector<8x128xf32>,
    } else {
    }
    return
  }
  func.func @transform_0(%arg0: i32, %arg1: i32) -> (i32, i32) {
    %c0_i32 = arith.constant 0 : i32
    return %arg0, %arg1 : i32, i32
  }
  func.func @transform_1(%arg0: i32, %arg1: i32) -> (i32, i32) {
    %c0_i32 = arith.constant 0 : i32
    %c0_i32_0 = arith.constant 0 : i32
    return %arg1, %c0_i32 : i32, i32
  }
  func.func @transform_2(%arg0: i32, %arg1: i32) -> (i32, i32) {
    %c0_i32 = arith.constant 0 : i32
    %c0_i32_0 = arith.constant 0 : i32
    %c0_i32_1 = arith.constant 0 : i32
    return %c0_i32, %c0_i32_0 : i32, i32
  }
  func.func @transform_3(%arg0: i32, %arg1: i32) -> (i32, i32) {
    %c0_i32 = arith.constant 0 : i32
    %c0_i32_0 = arith.constant 0 : i32
    %c0_i32_1 = arith.constant 0 : i32
    return %c0_i32, %c0_i32_0 : i32, i32
  }
  func.func @transform_4(%arg0: i32, %arg1: i32) -> (i32, i32) {
    %c0_i32 = arith.constant 0 : i32
    %c0_i32_0 = arith.constant 0 : i32
    %c0_i32_1 = arith.constant 0 : i32
    return %c0_i32, %c0_i32_0 : i32, i32
  }
  func.func @transform_5(%arg0: i32, %arg1: i32) -> (i32, i32) {
    %c0_i32 = arith.constant 0 : i32
    %c0_i32_0 = arith.constant 0 : i32
    return %arg0, %c0_i32 : i32, i32
  }
  func.func @transform_6(%arg0: i32, %arg1: i32) -> (i32, i32) {
    %c0_i32 = arith.constant 0 : i32
    %c0_i32_0 = arith.constant 0 : i32
    return %arg0, %c0_i32 : i32, i32
  }
}

</mosaic_0001>

<bundles_post_ra>
// kernel: tpu_custom_call.1
= control target key start
LH: loop header
LB: loop body
LE: loop exit
PB: predicated region body
PF: predicated region fallthrough
CT: control target
= control target key end

     0   :  { %s1464_s0 = inlined_call_operand.hbm [shape: f32[8,1024], index: 0, kind: input, shape index: {}]   ;;  %s1465_s1 = inlined_call_operand.hbm [shape: bf16[1024,128], index: 1, kind: input, shape index: {}]   ;;  %s1466_s2 = inlined_call_operand.vmem [shape: f32[1,128], index: 2, kind: input, shape index: {}]   ;;  %s1467_s3 = inlined_call_operand.vmem [shape: f32[1,128], index: 3, kind: input, shape index: {}]   ;;  %s1468_s4 = inlined_call_operand.<no memory space> [shape: f32[1,1], index: 4, kind: input, shape index: {}]   ;;  %s1469_s5 = inlined_call_operand.hbm [shape: f32[8,128], index: 5, kind: output, shape index: {0}]   ;;  %s1470_s6 = inlined_call_operand.hbm [shape: f32[8,128], index: 6, kind: output, shape index: {1}]  }
   0x1   :  { %12 = sst [smem:[#allocation3]] %s1468_s4 }
   0x2   :  { %13 = vsyncpa [#allocation5], 0 }
   0x3   :  { %15 = vsyncpa [#allocation5 + $0x1], 0 }
   0x4   :  { %16 = vsyncpa [#allocation8], 0 }
   0x5   :  { %18 = vsyncpa [#allocation8 + $0x1], 0 }
   0x6   :  { %19 = vsyncpa [#allocation6], 0 }
   0x7   :  { %20 = vsyncpa [#allocation11], 0  ;;  %s1285_s23 = smov 0   ;;  %s1287_s24 = smov 0  }
   0x8   :  { %s1289_s25 = smov 0   ;;  %s1291_s26 = smov 0  }
   0x9   :  { %s1293_s27 = smov 0   ;;  %s1295_s28 = smov 0  }
   0xa LB: > { %s801_s4 = sadd.s32 4294967295, %s1240_s28   ;;  %s35_s29 = sadd.s32 1, %s1236_s27  ;;  %s1240_s28 = sphi %s1295_s28, %s26_s28   ;;  %s1236_s27 = sphi %s1293_s27, %s1479_s27   ;;  %s1232_s26 = sphi %s1291_s26, %s1478_s26   ;;  %s1228_s25 = sphi %s1289_s25, %s1477_s25   ;;  %s1224_s24 = sphi %s1287_s24, %s1476_s24   ;;  %s1220_s23 = sphi %s1285_s23, %s1475_s23  }
   0xb   : > { %p36_p0 = scmp.ge.s32.totalorder %s35_s29, 2  ;;  %s47_s30 = sadd.s32 1, %s1228_s25 }
   0xc   : > { %p54_p1 = scmp.ne.s32.totalorder %s1228_s25, %s1224_s24  ;;  %p55_p2 = scmp.eq.s32.totalorder %s1240_s28, 0 }
   0xd   : > { %s1481_s29 = smov (%p36_p0, %s35_s29), 0  ;;  %p60_p4 = scmp.ne.s32.totalorder %s1224_s24, %s1220_s23 }
   0xe   : > { %p1321_p3 = por %p55_p2, %p54_p1  ;;  %s43_s8 = ssub.s32 %s1236_s27, %s1481_s29 }
   0xf   : > { %p61_p5 = scmp.eq.s32.totalorder %s801_s4, 0  ;;  %p45_p6 = scmp.eq.s32.totalorder %s43_s8, 0 }
  0x10   : > { %p1002_p8 = scmp.lt.s32.totalorder %s1240_s28, 2  ;;  %s1339_s11 = sand.u32 1, %s1228_s25  }
  0x11   : > { %p1330_p7 = por %p61_p5, %p60_p4  ;;  %s949_s12 = sshll.u32 %s1236_s27, 5 }
  0x12   : > { %s1336_s10 = scalar_select %p45_p6, %s1228_s25, %s47_s30  }
  0x13   : > { %s804_s13 = sshll.u32 %s1339_s11, 5  ;;  %s245_s16 = scalar_lea.hbm %s1464_s0, %s949_s12 }
  0x14   : > { %s247_s17 = sshll.u32 %s245_s16, 4  ;;  %s238_s18 = scalar_lea.vmem [#allocation4], %s804_s13  ;;  %s248_s17 = int_to_ptr.hbm [resolvable:$true] %s247_s17 }
  0x15   : > { %s249_s19 = sshll.u32 %s238_s18, 4  ;;  %p1348_p9 = pnand %p1002_p8, %p1321_p3  ;;  %s250_s19 = int_to_ptr.vmem [resolvable:$true] %s249_s19 }
  0x16   : > { %p810_p10 = scmp.ge.s32.totalorder %s1240_s28, 1  ;;  %p276_p11 = scmp.lt.s32.totalorder %s1240_s28, 3 }
  0x17   : > { %s807_s21 = sshll.u32 %s1339_s11, 8  ;;  %s235_s22 = scalar_lea.sflag [#allocation5], %s1339_s11 }
  0x18   : > { %998 = dma.hbm_to_vmem [thread:$0]  (!%p1348_p9), %s248_s17, 512, %s250_s19, %s235_s22  }
  0x19   : > { %p277_p12 = pnand %p810_p10, %p276_p11  ;;  %s950_s23 = sshll.u32 %s1236_s27, 8 }
  0x1a   : > { %s260_s30 = scalar_lea.vmem [#allocation7], %s807_s21  ;;  %s265_s7 = scalar_lea.hbm %s1465_s1, %s950_s23 }
  0x1b   : > { %s268_s8 = sshll.u32 %s260_s30, 4  ;;  %s266_s14 = sshll.u32 %s265_s7, 4  ;;  %s269_s8 = int_to_ptr.vmem [resolvable:$true] %s268_s8  ;;  %s267_s14 = int_to_ptr.hbm [resolvable:$true] %s266_s14 }
  0x1c   : > { %s257_s15 = scalar_lea.sflag [#allocation8], %s1339_s11  ;;  %s1242_s16 = smov 64  }
  0x1d   : > { %s1243_s18 = smov 4   ;;  %280 = sbr.rel (%p277_p12) target bundleno = 362 (0x16a), region = 40 }
  0x1e   : > { %1001 = dma.hbm_to_vmem [thread:$0]  (!%p1348_p9), %s267_s14, 4096, %s269_s8, %s257_s15, %s1242_s16, %s1242_s16, %s1243_s18  }
  0x1f   : > { %s282_s17 = sand.u32 (!%p277_p12), 1, %s1224_s24  }
  0x20   : > { %s811_s19 = sshll.u32 (!%p277_p12), %s282_s17, 5  ;;  %s283_s22 = scalar_lea.sflag (!%p277_p12), [#allocation5], %s282_s17 }
  0x21   : > { %s1366_s21 = scalar_lea.vmem (!%p277_p12), [#allocation4], %s811_s19 }
  0x22   : > { %1203 = dma.done.wait (%p1330_p7), %s283_s22, 512  }
  0x23   : > { %1205 = vsyncadd (%p1330_p7), %s283_s22, 4294966784  ;;  %s812_s23 = sshll.u32 %s282_s17, 8  ;;  %s293_s11 = scalar_lea.sflag [#allocation8], %s282_s17 }
  0x24   : > { %s1372_s30 = scalar_lea.vmem [#allocation7], %s812_s23 }
  0x25   : > { %1207 = dma.done.wait (%p1330_p7), %s293_s11, 4096  }
  0x26   : > { %1209 = vsyncadd (%p1330_p7), %s293_s11, 4294963200  ;;  %p813_p13 = scmp.ne.s32.totalorder %s1232_s26, 0 }
  0x28   : > { %331 = sbr.rel (%p813_p13) target bundleno = 47 (0x2f), region = 52 }
  0x2d   : > { %v1244_v0 = vmov 0.0  }
  0x2e   : > { %332 = vst [vmem:[#allocation2] sm:$0xff] %v1244_v0 }
  0x2f PF: > { %v958_v1 = vld [vmem:[%s1372_s30 + $0x38] sm:$0xff]  ;;  %v957_v5 = vld [vmem:[%s1372_s30 + $0x30] sm:$0xff]  ;;  %v956_v9 = vld [vmem:[%s1372_s30 + $0x28] sm:$0xff]  ;;  %p942_p0 = scmp.ne.s32.totalorder %s1232_s26, 1 }
  0x30   : > { %v966_v2 = vld [vmem:[%s1372_s30 + $0x78] sm:$0xff]  ;;  %598 = vmatpush.bf16.msra.mxu0 %v958_v1  ;;  %v965_v6 = vld [vmem:[%s1372_s30 + $0x70] sm:$0xff]  ;;  %v964_v10 = vld [vmem:[%s1372_s30 + $0x68] sm:$0xff]  ;;  %s671_s13 = sld [smem:[#allocation3]] (!%p942_p0) }
  0x31   : > { %v974_v3 = vld [vmem:[%s1372_s30 + $0xb8] sm:$0xff]  ;;  %611 = vmatpush.bf16.msra.mxu1 %v966_v2  ;;  %v973_v7 = vld [vmem:[%s1372_s30 + $0xb0] sm:$0xff]  ;;  %v972_v11 = vld [vmem:[%s1372_s30 + $0xa8] sm:$0xff] }
  0x32   : > { %v982_v4 = vld [vmem:[%s1372_s30 + $0xf8] sm:$0xff]  ;;  %624 = vmatpush.bf16.msra.mxu2 %v974_v3  ;;  %v981_v8 = vld [vmem:[%s1372_s30 + $0xf0] sm:$0xff]  ;;  %v980_v12 = vld [vmem:[%s1372_s30 + $0xe8] sm:$0xff] }
  0x33   : > { %637 = vmatpush.bf16.msra.mxu3 %v982_v4  ;;  %v955_v13 = vld [vmem:[%s1372_s30 + $0x20] sm:$0xff]  ;;  %v954_v17 = vld [vmem:[%s1372_s30 + $0x18] sm:$0xff]  ;;  %v953_v21 = vld [vmem:[%s1372_s30 + $0x10] sm:$0xff] }
  0x34   : > { %599 = vmatpush.bf16.msra.mxu0 %v957_v5  ;;  %v963_v14 = vld [vmem:[%s1372_s30 + $0x60] sm:$0xff]  ;;  %v962_v18 = vld [vmem:[%s1372_s30 + $0x58] sm:$0xff]  ;;  %v961_v22 = vld [vmem:[%s1372_s30 + $0x50] sm:$0xff] }
  0x35   : > { %612 = vmatpush.bf16.msra.mxu1 %v965_v6  ;;  %v971_v15 = vld [vmem:[%s1372_s30 + $0xa0] sm:$0xff]  ;;  %v970_v19 = vld [vmem:[%s1372_s30 + $0x98] sm:$0xff]  ;;  %v969_v23 = vld [vmem:[%s1372_s30 + $0x90] sm:$0xff] }
  0x36   : > { %625 = vmatpush.bf16.msra.mxu2 %v973_v7  ;;  %v979_v16 = vld [vmem:[%s1372_s30 + $0xe0] sm:$0xff]  ;;  %v978_v20 = vld [vmem:[%s1372_s30 + $0xd8] sm:$0xff]  ;;  %v977_v24 = vld [vmem:[%s1372_s30 + $0xd0] sm:$0xff] }
  0x37   : > { %638 = vmatpush.bf16.msra.mxu3 %v981_v8  ;;  %v952_v25 = vld [vmem:[%s1372_s30 + $0x8] sm:$0xff]  ;;  %v951_v29 = vld [vmem:[%s1372_s30] sm:$0xff]  ;;  %v335_v35 = vld [vmem:[%s1366_s21 + $0x10] sm:$0xff] }
  0x38   : > { %600 = vmatpush.bf16.msra.mxu0 %v956_v9  ;;  %v960_v26 = vld [vmem:[%s1372_s30 + $0x48] sm:$0xff]  ;;  %v959_v30 = vld [vmem:[%s1372_s30 + $0x40] sm:$0xff]  ;;  %v336_v36 = vld [vmem:[%s1366_s21 + $0x18] sm:$0xff]  ;;  %v339_v39 = vpack.c.bf16 %v335_v35, %v335_v35 }
  0x39   : > { %613 = vmatpush.bf16.msra.mxu1 %v964_v10  ;;  %v968_v27 = vld [vmem:[%s1372_s30 + $0x88] sm:$0xff]  ;;  %v967_v31 = vld [vmem:[%s1372_s30 + $0x80] sm:$0xff]  ;;  %v340_v40 = vpack.c.bf16 %v336_v36, %v336_v36  ;;  %v341_v49 = vld [vmem:[#allocation2] sm:$0xff] }
  0x3a   : > { %626 = vmatpush.bf16.msra.mxu2 %v972_v11  ;;  %v976_v28 = vld [vmem:[%s1372_s30 + $0xc8] sm:$0xff]  ;;  %v333_v32 = vld [vmem:[%s1366_s21] sm:$0xff] }
  0x3b   : > { %639 = vmatpush.bf16.msra.mxu3 %v980_v12  ;;  %v334_v33 = vld [vmem:[%s1366_s21 + $0x8] sm:$0xff]  ;;  %v975_v34 = vld [vmem:[%s1372_s30 + $0xc0] sm:$0xff]  ;;  %v337_v37 = vpack.c.bf16 %v333_v32, %v333_v32 }
  0x3c   : > { %601 = vmatpush.bf16.msra.mxu0 %v955_v13  ;;  %v338_v38 = vpack.c.bf16 %v334_v33, %v334_v33 }
  0x3d   : > { %614 = vmatpush.bf16.msra.mxu1 %v963_v14 }
  0x3e   : > { %627 = vmatpush.bf16.msra.mxu2 %v971_v15 }
  0x3f   : > { %640 = vmatpush.bf16.msra.mxu3 %v979_v16 }
  0x40   : > { %602 = vmatpush.bf16.msra.mxu0 %v954_v17 }
  0x41   : > { %615 = vmatpush.bf16.msra.mxu1 %v962_v18 }
  0x42   : > { %628 = vmatpush.bf16.msra.mxu2 %v970_v19 }
  0x43   : > { %641 = vmatpush.bf16.msra.mxu3 %v978_v20 }
  0x44   : > { %603 = vmatpush.bf16.msra.mxu0 %v953_v21 }
  0x45   : > { %616 = vmatpush.bf16.msra.mxu1 %v961_v22 }
  0x46   : > { %629 = vmatpush.bf16.msra.mxu2 %v969_v23 }
  0x47   : > { %642 = vmatpush.bf16.msra.mxu3 %v977_v24 }
  0x48   : > { %604 = vmatpush.bf16.msra.mxu0 %v952_v25 }
  0x49   : > { %617 = vmatpush.bf16.msra.mxu1 %v960_v26 }
  0x4a   : > { %630 = vmatpush.bf16.msra.mxu2 %v968_v27 }
  0x4b   : > { %643 = vmatpush.bf16.msra.mxu3 %v976_v28 }
  0x4c   : > { %605 = vmatpush.bf16.msra.mxu0 %v951_v29 }
  0x4d   : > { %618 = vmatpush.bf16.msra.mxu1 %v959_v30 }
  0x4e   : > { %631 = vmatpush.bf16.msra.mxu2 %v967_v31 }
  0x4f   : > { %644 = vmatpush.bf16.msra.mxu3 %v975_v34  ;;  %606 = vmatmul.bf16.vlgmr.msra.gmra.mxu0 %v337_v37 }
  0x50   : > { %619 = vmatmul.bf16.vlgmr.msra.gmra.mxu1 %v338_v38 }
  0x51   : > { %632 = vmatmul.bf16.vlgmr.msra.gmra.mxu2 %v339_v39 }
  0x52   : > { %645 = vmatmul.bf16.vlgmr.msra.gmra.mxu3 %v340_v40 }
  0xcc   : > { %v607_v41 = vpop.f32.mrf.mxu0 }
  0xcd   : > { %v620_v42 = vpop.f32.mrf.mxu1 }
  0xce   : > { %v621_v43 = vadd.f32 %v620_v42, %v607_v41 }
  0xd4   : > { %v633_v44 = vpop.f32.mrf.mxu2  ;;  %v609_v47 = vpop.f32.mrf.mxu0 }
  0xd5   : > { %v646_v45 = vpop.f32.mrf.mxu3  ;;  %v634_v46 = vadd.f32 %v633_v44, %v621_v43  ;;  %v622_v48 = vpop.f32.mrf.mxu1 }
  0xd7   : > { %v647_v50 = vadd.f32 %v646_v45, %v634_v46 }
  0xd9   : > { %v650_v51 = vadd.f32 %v647_v50, %v341_v49  ;;  %655 = sbr.rel (%p942_p0) target bundleno = 352 (0x160), region = 56 }
  0xdb   : > { %651 = vst [vmem:[#allocation2] sm:$0xff] %v650_v51 }
  0xdc   : > { %v635_v52 = vpop.f32.mrf.mxu2 }
  0xdd   : > { %v648_v53 = vpop.f32.mrf.mxu3 }
  0xde   : > { %v1060_v55 = vld [vmem:[%s1466_s2] ss:$0 sm:$0xff]  ;;  %v672_v60 = vstv %s671_s13 }
  0xdf   : > { %v1061_v57 = vld [vmem:[%s1467_s3] ss:$0 sm:$0xff] }
  0xe2   : > { %v656_v54 = vld [vmem:[#allocation2] sm:$0xff] }
  0xe3   : > { %v661_v56 = vadd.f32 %v1060_v55, %v656_v54 }
  0xe5   : > { %v662_v58 = vmax.f32 %v661_v56, 0.0 }
  0xe7   : > { %663 = vst [vmem:[#allocation10] sm:$0xff] %v662_v58  ;;  %v668_v59 = vmul.f32 %v1061_v57, %v662_v58 }
  0xe9   : > { %669 = vadd.xlane.f32.xlu0 %v668_v59 }
 0x15c   : > { %v670_v61 = vpop.xlane.xlu0 %669 }
 0x15d   : > { %v673_v62 = vadd.f32 %v672_v60, %v670_v61 }
 0x15f   : > { %674 = vst [vmem:[#allocation9] sm:$0xff] %v673_v62 }
 0x160 PF: > { %p1424_p1 = scmp.eq.s32.totalorder %s801_s4, 1  ;;  %s685_s15 = sshll.u32 %s1469_s5, 4  ;;  %s686_s15 = int_to_ptr.hbm [resolvable:$true] %s685_s15 }
 0x161   : > { %s1245_s16 = smov [#allocation9]   ;;  %s1246_s17 = smov [#allocation10]  }
 0x162   : > { %s683_s18 = sshll.u32 %s1245_s16, 4  ;;  %s697_s19 = sshll.u32 %s1246_s17, 4  ;;  %s684_s18 = int_to_ptr.vmem [resolvable:$true] %s683_s18  ;;  %s698_s19 = int_to_ptr.vmem [resolvable:$true] %s697_s19 }
 0x163   : > { %988 = dma.vmem_to_hbm [thread:$0]  (%p1424_p1), %s684_s18, 128, %s686_s15, [#allocation6]  }
 0x164   : > { %s699_s21 = sshll.u32 %s1470_s6, 4  ;;  %s700_s21 = int_to_ptr.hbm [resolvable:$true] %s699_s21 }
 0x165   : > { %990 = dma.vmem_to_hbm [thread:$0]  (%p1424_p1), %s698_s19, 128, %s700_s21, [#allocation11]  }
 0x166   : > { %1211 = dma.done.wait (%p1424_p1), [#allocation6], 128  }
 0x167   : > { %1213 = vsyncadd (%p1424_p1), [#allocation6], 4294967168 }
 0x168   : > { %1215 = dma.done.wait (%p1424_p1), [#allocation11], 128  }
 0x169   : > { %1217 = vsyncadd (%p1424_p1), [#allocation11], 4294967168 }
 0x16a PF: > { %s26_s28 = sadd.s32 1, %s1240_s28   ;;  %s1475_s23 = smov %s1224_s24 }
 0x16b   : > { %p23_p2 = scmp.ge.s32.totalorder %s26_s28, 4   ;;  %s1476_s24 = smov %s1228_s25 }
 0x16c   : > { %s1477_s25 = smov %s1336_s10  ;;  %s1478_s26 = smov %s1236_s27 }
 0x16d   : > { %s1479_s27 = smov %s1481_s29  ;;  %25 = sbr.rel (!%p23_p2) target bundleno = 10 (0xa), region = 108 }
 0x172   :  { %718 = vsyncpa [#allocation5], 1 }
 0x173   :  { %720 = vsyncpa [#allocation5 + $0x1], 1 }
 0x174   :  { %721 = vsyncpa [#allocation8], 1 }
 0x175   :  { %723 = vsyncpa [#allocation8 + $0x1], 1 }
 0x176   :  { %724 = vsyncpa [#allocation6], 1 }
 0x177   :  { %726 = vsyncpa [#allocation6 + $0x1], 1 }
 0x178   :  { %727 = vsyncpa [#allocation11], 1 }

</bundles_post_ra>
